<compile_context>
chip_gen: v5e
topology: v5e:2x2
jax: 0.10.0
libtpu: 0.0.40
codegen_flags: <defaults>
</compile_context>

<pallas_src>
from functools import partial

import jax
import jax.numpy as jnp
from jax.experimental import pallas as pl
from jax.experimental.pallas import tpu as pltpu


def decoder_kernel(x_ref, w1_ref, b1_ref, w2_ref, b2_ref, o_ref):
    x = x_ref[...]                      # (TB, D_in)  f32
    d_in = x.shape[1]

    # ---- Layer 1 on the VPU: D_in is tiny (3), skip the MXU entirely. ----
    h = b1_ref[...]                     # (1, H) -> broadcasts to (TB, H)
    for k in range(d_in):               # static unrolled loop (D_in FMAs)
        h = h + x[:, k:k + 1] * w1_ref[k:k + 1, :]
    h = jnp.maximum(h, 0.0)             # ReLU

    # ---- Layer 2 on the MXU: bf16 operands, f32 accumulation. ----
    y = jnp.dot(h.astype(w2_ref.dtype), w2_ref[...],
                preferred_element_type=jnp.float32)
    o_ref[...] = (y + b2_ref[...]).astype(o_ref.dtype)   # (TB, D_out)


def prepare_decoder_params(w1, b1, w2, b2):
    """One-time parameter packing: bf16 cast of the big layer-2 weight and
    row-shaped biases.  Do NOT redo this per forward call."""
    return {
        "w1": jnp.asarray(w1, jnp.float32),                 # (D_in, H)
        "b1": jnp.asarray(b1, jnp.float32).reshape(1, -1),  # (1, H)
        "w2": jnp.asarray(w2, jnp.bfloat16),                # (H, D_out) bf16
        "b2": jnp.asarray(b2, jnp.float32).reshape(1, -1),  # (1, D_out)
    }


@partial(jax.jit, static_argnames=("tile_b",))
def decoder_forward(params, x, *, tile_b=512):
    w1, b1, w2, b2 = params["w1"], params["b1"], params["w2"], params["b2"]
    B, D_in = x.shape
    H, D_out = w2.shape

    # Batch tiling: cap the tile at half the batch (rounded to sublanes) so
    # the grid has >= 2 steps whenever possible -> both v7x TensorCores get
    # work via dimension_semantics=("parallel",).
    half = (((B + 1) // 2) + 7) // 8 * 8
    TB = max(8, min(tile_b, half))
    B_pad = ((B + TB - 1) // TB) * TB
    xp = x if B_pad == B else jnp.pad(x, ((0, B_pad - B), (0, 0)))

    out = pl.pallas_call(
        decoder_kernel,
        out_shape=jax.ShapeDtypeStruct((B_pad, D_out), jnp.float32),
        grid=(B_pad // TB,),
        in_specs=[
            pl.BlockSpec((TB, D_in), lambda i: (i, 0)),     # x: tiled over batch
            pl.BlockSpec((D_in, H),  lambda i: (0, 0)),     # w1: VMEM-resident
            pl.BlockSpec((1, H),     lambda i: (0, 0)),     # b1: VMEM-resident
            pl.BlockSpec((H, D_out), lambda i: (0, 0)),     # w2 (bf16): resident
            pl.BlockSpec((1, D_out), lambda i: (0, 0)),     # b2: resident
        ],
        out_specs=pl.BlockSpec((TB, D_out), lambda i: (i, 0)),
        compiler_params=pltpu.CompilerParams(
            dimension_semantics=("parallel",)),             # megacore on v7x
    )(xp, w1, b1, w2, b2)

    # Padded batch rows contain relu(b1) @ w2 + b2 (garbage) -> slice them off.
    return out if B_pad == B else out[:B]


def init_linear_params(key, fan_in, fan_out):
    # Deterministic init mimicking torch.nn.Linear default:
    # U(-1/sqrt(fan_in), 1/sqrt(fan_in)) for both weight and bias.
    kw, kb = jax.random.split(key)
    bound = 1.0 / jnp.sqrt(jnp.float32(fan_in))
    w = jax.random.uniform(kw, (fan_in, fan_out), jnp.float32, -bound, bound)
    b = jax.random.uniform(kb, (1, fan_out), jnp.float32, -bound, bound)
    return w, b


def _reference(x, w1, b1, w2, b2):
    # Pure-JAX reference of the same math with the same bf16 weight cast for
    # layer 2 (f32 accumulation), matching the kernel's numerics.
    h = jnp.maximum(x @ w1 + b1, 0.0)
    return jnp.dot(h.astype(jnp.bfloat16), w2.astype(jnp.bfloat16),
                   preferred_element_type=jnp.float32) + b2


if __name__ == "__main__":
    img_width, img_height, img_channel = 28, 28, 1
    hiddens = [3, 64]
    D_in, H = hiddens
    D_out = img_width * img_height * img_channel  # 784

    key = jax.random.PRNGKey(0)
    k_x, k_x2, k_l1, k_l2 = jax.random.split(key, 4)

    w1, b1 = init_linear_params(k_l1, D_in, H)
    w2, b2 = init_linear_params(k_l2, H, D_out)
    params = prepare_decoder_params(w1, b1, w2, b2)   # one-time bf16 pack

    # Case 1: small batch (single tile, no row padding).
    B = 8
    x = jax.random.normal(k_x, (B, D_in), jnp.float32)
    out = jax.block_until_ready(decoder_forward(params, x))
    ref = _reference(x, w1, b1, w2, b2)
    assert out.shape == (B, D_out)
    assert jnp.allclose(out, ref, atol=1e-2, rtol=1e-2)

    # Case 2: batch that exercises the 2-step grid + row-pad/slice path.
    B2 = 20
    x2 = jax.random.normal(k_x2, (B2, D_in), jnp.float32)
    out2 = jax.block_until_ready(decoder_forward(params, x2))
    ref2 = _reference(x2, w1, b1, w2, b2)
    assert out2.shape == (B2, D_out)
    assert jnp.allclose(out2, ref2, atol=1e-2, rtol=1e-2)

    print("KERNEL_OK")
</pallas_src>

<mosaic_0001>
module attributes {stable_mosaic.version = 11 : i64} {
  func.func @decoder_kernel(%arg0: i32, %arg1: memref<8x3xf32, #tpu.memory_space<vmem>>, %arg2: memref<3x64xf32, #tpu.memory_space<vmem>>, %arg3: memref<1x64xf32, #tpu.memory_space<vmem>>, %arg4: memref<64x784xbf16, #tpu.memory_space<vmem>>, %arg5: memref<1x784xf32, #tpu.memory_space<vmem>>, %arg6: memref<8x784xf32, #tpu.memory_space<vmem>>) attributes {dimension_semantics = [#tpu.dimension_semantics<parallel>], iteration_bounds = array<i64: 1>, scalar_prefetch = 0 : i64, scratch_operands = 0 : i64, tpu.core_type = #tpu.core_type<tc>, window_params = [{transform_indices = @transform_0, window_bounds = array<i64: 8, 3>}, {pipeline_mode = #tpu.pipeline_mode<synchronous>, transform_indices = @transform_1, window_bounds = array<i64: 3, 64>}, {pipeline_mode = #tpu.pipeline_mode<synchronous>, transform_indices = @transform_2, window_bounds = array<i64: 1, 64>}, {pipeline_mode = #tpu.pipeline_mode<synchronous>, transform_indices = @transform_3, window_bounds = array<i64: 64, 784>}, {pipeline_mode = #tpu.pipeline_mode<synchronous>, transform_indices = @transform_4, window_bounds = array<i64: 1, 784>}, {transform_indices = @transform_5, window_bounds = array<i64: 8, 784>}]} {
    %c0 = arith.constant 0 : index
    %c0_0 = arith.constant 0 : index
    %0 = vector.load %arg1[%c0, %c0_0] : memref<8x3xf32, #tpu.memory_space<vmem>>, vector<8x3xf32>
    %c0_1 = arith.constant 0 : index
    %c0_2 = arith.constant 0 : index
    %1 = vector.load %arg3[%c0_1, %c0_2] : memref<1x64xf32, #tpu.memory_space<vmem>>, vector<1x64xf32>
    %2 = vector.extract_strided_slice %0 {offsets = [0, 0], sizes = [8, 1], strides = [1, 1]} : vector<8x3xf32> to vector<8x1xf32>
    %c0_3 = arith.constant 0 : index
    %c0_4 = arith.constant 0 : index
    %3 = vector.load %arg2[%c0_3, %c0_4] : memref<3x64xf32, #tpu.memory_space<vmem>>, vector<1x64xf32>
    %4 = vector.broadcast %2 : vector<8x1xf32> to vector<8x64xf32>
    %5 = vector.broadcast %3 : vector<1x64xf32> to vector<8x64xf32>
    %6 = arith.mulf %4, %5 : vector<8x64xf32>
    %7 = vector.broadcast %1 : vector<1x64xf32> to vector<8x64xf32>
    %8 = arith.addf %7, %6 : vector<8x64xf32>
    %9 = vector.extract_strided_slice %0 {offsets = [0, 1], sizes = [8, 1], strides = [1, 1]} : vector<8x3xf32> to vector<8x1xf32>
    %c1 = arith.constant 1 : index
    %c0_5 = arith.constant 0 : index
    %10 = vector.load %arg2[%c1, %c0_5] : memref<3x64xf32, #tpu.memory_space<vmem>>, vector<1x64xf32>
    %11 = vector.broadcast %9 : vector<8x1xf32> to vector<8x64xf32>
    %12 = vector.broadcast %10 : vector<1x64xf32> to vector<8x64xf32>
    %13 = arith.mulf %11, %12 : vector<8x64xf32>
    %14 = arith.addf %8, %13 : vector<8x64xf32>
    %15 = vector.extract_strided_slice %0 {offsets = [0, 2], sizes = [8, 1], strides = [1, 1]} : vector<8x3xf32> to vector<8x1xf32>
    %c2 = arith.constant 2 : index
    %c0_6 = arith.constant 0 : index
    %16 = vector.load %arg2[%c2, %c0_6] : memref<3x64xf32, #tpu.memory_space<vmem>>, vector<1x64xf32>
    %17 = vector.broadcast %15 : vector<8x1xf32> to vector<8x64xf32>
    %18 = vector.broadcast %16 : vector<1x64xf32> to vector<8x64xf32>
    %19 = arith.mulf %17, %18 : vector<8x64xf32>
    %20 = arith.addf %14, %19 : vector<8x64xf32>
    %cst = arith.constant 0.000000e+00 : f32
    %21 = vector.broadcast %cst : f32 to vector<8x64xf32>
    %22 = arith.maximumf %20, %21 : vector<8x64xf32>
    %23 = arith.truncf %22 : vector<8x64xf32> to vector<8x64xbf16>
    %c0_7 = arith.constant 0 : index
    %c0_8 = arith.constant 0 : index
    %24 = vector.load %arg4[%c0_7, %c0_8] : memref<64x784xbf16, #tpu.memory_space<vmem>>, vector<64x784xbf16>
    %cst_9 = arith.constant dense<0.000000e+00> : vector<8x784xf32>
    %25 = tpu.matmul %23, %24, %cst_9 {dimension_numbers = #tpu.dot_dimension_numbers<[1], [0], [0], [1], [0, 0, 1, 1], [], []>} : vector<8x64xbf16>, vector<64x784xbf16>, vector<8x784xf32> -> vector<8x784xf32>
    %c0_10 = arith.constant 0 : index
    %c0_11 = arith.constant 0 : index
    %26 = vector.load %arg5[%c0_10, %c0_11] : memref<1x784xf32, #tpu.memory_space<vmem>>, vector<1x784xf32>
    %27 = vector.broadcast %26 : vector<1x784xf32> to vector<8x784xf32>
    %28 = arith.addf %25, %27 : vector<8x784xf32>
    %c0_12 = arith.constant 0 : index
    %c0_13 = arith.constant 0 : index
    %29 = vector.load %arg6[%c0_12, %c0_13] : memref<8x784xf32, #tpu.memory_space<vmem>>, vector<8x784xf32>
    tpu.vector_store %arg6[%c0_12, %c0_13], %28 {strides = array<i32>} : memref<8x784xf32, #tpu.memory_space<vmem>>, vector<8x784xf32>,
    return
  }
  func.func @transform_0(%arg0: i32) -> (i32, i32) {
    %c0_i32 = arith.constant 0 : i32
    %c0_i32_0 = arith.constant 0 : i32
    return %arg0, %c0_i32 : i32, i32
  }
  func.func @transform_1(%arg0: i32) -> (i32, i32) {
    %c0_i32 = arith.constant 0 : i32
    %c0_i32_0 = arith.constant 0 : i32
    %c0_i32_1 = arith.constant 0 : i32
    return %c0_i32, %c0_i32_0 : i32, i32
  }
  func.func @transform_2(%arg0: i32) -> (i32, i32) {
    %c0_i32 = arith.constant 0 : i32
    %c0_i32_0 = arith.constant 0 : i32
    %c0_i32_1 = arith.constant 0 : i32
    return %c0_i32, %c0_i32_0 : i32, i32
  }
  func.func @transform_3(%arg0: i32) -> (i32, i32) {
    %c0_i32 = arith.constant 0 : i32
    %c0_i32_0 = arith.constant 0 : i32
    %c0_i32_1 = arith.constant 0 : i32
    return %c0_i32, %c0_i32_0 : i32, i32
  }
  func.func @transform_4(%arg0: i32) -> (i32, i32) {
    %c0_i32 = arith.constant 0 : i32
    %c0_i32_0 = arith.constant 0 : i32
    %c0_i32_1 = arith.constant 0 : i32
    return %c0_i32, %c0_i32_0 : i32, i32
  }
  func.func @transform_5(%arg0: i32) -> (i32, i32) {
    %c0_i32 = arith.constant 0 : i32
    %c0_i32_0 = arith.constant 0 : i32
    return %arg0, %c0_i32 : i32, i32
  }
}

</mosaic_0001>

<bundles_post_ra>
// kernel: decoder_forward.1
= control target key start
LH: loop header
LB: loop body
LE: loop exit
PB: predicated region body
PF: predicated region fallthrough
CT: control target
= control target key end

     0   :  { %10 = vsyncpa [#allocation3], 0  ;;  %s657_s0 = inlined_call_operand.vmem [shape: f32[8,3], index: 0, kind: input, shape index: {}]   ;;  %s658_s1 = inlined_call_operand.vmem [shape: f32[3,64], index: 1, kind: input, shape index: {}]   ;;  %s659_s2 = inlined_call_operand.vmem [shape: f32[1,64], index: 2, kind: input, shape index: {}]   ;;  %s660_s3 = inlined_call_operand.hbm [shape: bf16[64,784], index: 3, kind: input, shape index: {}]   ;;  %s661_s4 = inlined_call_operand.vmem [shape: f32[1,784], index: 4, kind: input, shape index: {}]   ;;  %s662_s5 = inlined_call_operand.hbm [shape: f32[8,784], index: 5, kind: output, shape index: {}]  }
   0x1   :  { %11 = vsyncpa [#allocation4], 0  ;;  %s22_s20 = sshll.u32 %s660_s3, 4  ;;  %s596_s21 = smov [#allocation2]   ;;  %s23_s20 = int_to_ptr.hbm [resolvable:$true] %s22_s20 }
   0x2   :  { %s24_s22 = sshll.u32 %s596_s21, 4  ;;  %s597_s23 = smov 448   ;;  %s25_s22 = int_to_ptr.vmem [resolvable:$true] %s24_s22 }
   0x3   :  { %s598_s24 = smov 28  }
   0x4   :  { %30 = dma.hbm_to_vmem [thread:$0]  %s23_s20, 3584, %s25_s22, [#allocation3], %s597_s23, %s597_s23, %s598_s24  }
   0x5   :  { %592 = dma.done.wait [#allocation3], 3584  }
   0x6   :  { %593 = vsyncadd [#allocation3], 4294963712  ;;  %v599_v0 = vmov 0   ;;  %v600_v1 = vmov 2   ;;  %v38_v2 = vld [vmem:[%s657_s0] sm:$0xff]  ;;  %v601_v3 = vmov 1  }
   0x7   :  { %536 = vset.pattern.permute.xlu0 %v599_v0  ;;  %538 = vset.pattern.permute.xlu1 %v600_v1  ;;  %v468_v4 = vld [vmem:[#allocation2 + $0xa8] sm:$0xf]  ;;  %v525_v5 = vld [vmem:[#allocation2 + $0xc0] sm:$0xf0]  ;;  %v522_v6 = vld [vmem:[#allocation2 + $0xac] sm:$0xf] }
   0x8   :  { %43 = vperm.xlu0 %536, %v38_v2   ;;  %62 = vperm.xlu1 %538, %v38_v2   ;;  %v469_v7 = vor.u32 %v525_v5, %v468_v4  ;;  %v470_v8 = vld [vmem:[#allocation2 + $0xc4] sm:$0xf0]  ;;  %v476_v9 = vld [vmem:[#allocation2 + $0xb0] sm:$0xf]  ;;  %v526_v10 = vld [vmem:[#allocation2 + $0xc8] sm:$0xf0] }
   0x9   :  { %v473_v11 = vor.u32 %v522_v6, %v470_v8  ;;  %v477_v12 = vor.u32 %v526_v10, %v476_v9  ;;  %v523_v13 = vld [vmem:[#allocation2 + $0xb4] sm:$0xf]  ;;  %v478_v14 = vld [vmem:[#allocation2 + $0xcc] sm:$0xf0]  ;;  %v518_v17 = vld [vmem:[#allocation2 + $0x88] sm:$0xf0] }
   0xa   :  { %v440_v15 = vld [vmem:[#allocation2 + $0x70] sm:$0xf]  ;;  %270 = vmatpush.bf16.msra.mxu0 %v469_v7  ;;  %v481_v16 = vor.u32 %v523_v13, %v478_v14  ;;  %v515_v18 = vld [vmem:[#allocation2 + $0x74] sm:$0xf]  ;;  %v448_v22 = vld [vmem:[#allocation2 + $0x78] sm:$0xf] }
   0xb   :  { %v442_v19 = vld [vmem:[#allocation2 + $0x8c] sm:$0xf0]  ;;  %283 = vmatpush.bf16.msra.mxu1 %v473_v11  ;;  %296 = vmatpush.bf16.msra.mxu2 %v477_v12  ;;  %v441_v20 = vor.u32 %v518_v17, %v440_v15  ;;  %v519_v23 = vld [vmem:[#allocation2 + $0x90] sm:$0xf0]  ;;  %v516_v24 = vld [vmem:[#allocation2 + $0x7c] sm:$0xf] }
   0xc   :  { %v445_v21 = vor.u32 %v515_v18, %v442_v19  ;;  %309 = vmatpush.bf16.msra.mxu3 %v481_v16  ;;  %v449_v25 = vor.u32 %v519_v23, %v448_v22  ;;  %v450_v26 = vld [vmem:[#allocation2 + $0x94] sm:$0xf0]  ;;  %v511_v29 = vld [vmem:[#allocation2 + $0x50] sm:$0xf0]  ;;  %v508_v31 = vld [vmem:[#allocation2 + $0x3c] sm:$0xf] }
   0xd   :  { %v453_v27 = vor.u32 %v516_v24, %v450_v26  ;;  %v412_v28 = vld [vmem:[#allocation2 + $0x38] sm:$0xf]  ;;  %v420_v33 = vld [vmem:[#allocation2 + $0x40] sm:$0xf]  ;;  %v512_v35 = vld [vmem:[#allocation2 + $0x58] sm:$0xf0] }
   0xe   :  { %271 = vmatpush.bf16.msra.mxu0 %v441_v20  ;;  %v413_v30 = vor.u32 %v511_v29, %v412_v28  ;;  %v414_v32 = vld [vmem:[#allocation2 + $0x54] sm:$0xf0]  ;;  %v509_v36 = vld [vmem:[#allocation2 + $0x44] sm:$0xf]  ;;  %v422_v37 = vld [vmem:[#allocation2 + $0x5c] sm:$0xf0]  ;;  %v421_v38 = vor.u32 %v512_v35, %v420_v33 }
   0xf   :  { %284 = vmatpush.bf16.msra.mxu1 %v445_v21  ;;  %297 = vmatpush.bf16.msra.mxu2 %v449_v25  ;;  %v417_v34 = vor.u32 %v508_v31, %v414_v32  ;;  %v425_v39 = vor.u32 %v509_v36, %v422_v37  ;;  %v384_v40 = vld [vmem:[#allocation2] sm:$0xf]  ;;  %v504_v41 = vld [vmem:[#allocation2 + $0x18] sm:$0xf0]  ;;  %v501_v42 = vld [vmem:[#allocation2 + $0x4] sm:$0xf] }
  0x10   :  { %537 = vset.pattern.permute.xlu0 %v601_v3  ;;  %310 = vmatpush.bf16.msra.mxu3 %v453_v27  ;;  %v385_v43 = vor.u32 %v504_v41, %v384_v40  ;;  %v386_v44 = vld [vmem:[#allocation2 + $0x1c] sm:$0xf0]  ;;  %v392_v45 = vld [vmem:[#allocation2 + $0x8] sm:$0xf]  ;;  %v505_v46 = vld [vmem:[#allocation2 + $0x20] sm:$0xf0] }
  0x11   :  { %54 = vperm.xlu0 %537, %v38_v2   ;;  %v389_v47 = vor.u32 %v501_v42, %v386_v44  ;;  %v393_v48 = vor.u32 %v505_v46, %v392_v45  ;;  %v502_v49 = vld [vmem:[#allocation2 + $0xc] sm:$0xf]  ;;  %v394_v50 = vld [vmem:[#allocation2 + $0x24] sm:$0xf0]  ;;  %v492_v52 = vld [vmem:[#allocation2 + $0xc0] sm:$0xf] }
  0x12   :  { %272 = vmatpush.bf16.msra.mxu0 %v413_v30  ;;  %v397_v51 = vor.u32 %v502_v49, %v394_v50  ;;  %v528_v53 = vld [vmem:[#allocation2 + $0xd8] sm:$0xf0]  ;;  %v484_v54 = vld [vmem:[#allocation2 + $0xb8] sm:$0xf]  ;;  %v527_v56 = vld [vmem:[#allocation2 + $0xd0] sm:$0xf0] }
  0x13   :  { %285 = vmatpush.bf16.msra.mxu1 %v417_v34  ;;  %298 = vmatpush.bf16.msra.mxu2 %v421_v38  ;;  %v493_v55 = vor.u32 %v528_v53, %v492_v52  ;;  %v524_v57 = vld [vmem:[#allocation2 + $0xbc] sm:$0xf]  ;;  %v486_v58 = vld [vmem:[#allocation2 + $0xd4] sm:$0xf0]  ;;  %v485_v59 = vor.u32 %v527_v56, %v484_v54  ;;  %v464_v61 = vld [vmem:[#allocation2 + $0x88] sm:$0xf] }
  0x14   :  { %311 = vmatpush.bf16.msra.mxu3 %v425_v39  ;;  %v489_v60 = vor.u32 %v524_v57, %v486_v58  ;;  %v521_v62 = vld [vmem:[#allocation2 + $0xa0] sm:$0xf0]  ;;  %v456_v63 = vld [vmem:[#allocation2 + $0x80] sm:$0xf]  ;;  %v436_v6 = vld [vmem:[#allocation2 + $0x50] sm:$0xf] }
  0x15   :  { %v465_v0 = vor.u32 %v521_v62, %v464_v61  ;;  %v517_v2 = vld [vmem:[#allocation2 + $0x84] sm:$0xf]  ;;  %v458_v3 = vld [vmem:[#allocation2 + $0x9c] sm:$0xf0]  ;;  %v514_v7 = vld [vmem:[#allocation2 + $0x68] sm:$0xf0] }
  0x16   :  { %273 = vmatpush.bf16.msra.mxu0 %v385_v43  ;;  %v461_v5 = vor.u32 %v517_v2, %v458_v3  ;;  %v428_v8 = vld [vmem:[#allocation2 + $0x48] sm:$0xf]  ;;  %v513_v9 = vld [vmem:[#allocation2 + $0x60] sm:$0xf0]  ;;  %v510_v10 = vld [vmem:[#allocation2 + $0x4c] sm:$0xf]  ;;  %v437_v12 = vor.u32 %v514_v7, %v436_v6 }
  0x17   :  { %286 = vmatpush.bf16.msra.mxu1 %v389_v47  ;;  %299 = vmatpush.bf16.msra.mxu2 %v393_v48  ;;  %v430_v11 = vld [vmem:[#allocation2 + $0x64] sm:$0xf0]  ;;  %v429_v13 = vor.u32 %v513_v9, %v428_v8  ;;  %v408_v15 = vld [vmem:[#allocation2 + $0x18] sm:$0xf]  ;;  %v507_v16 = vld [vmem:[#allocation2 + $0x30] sm:$0xf0] }
  0x18   :  { %312 = vmatpush.bf16.msra.mxu3 %v397_v51  ;;  %v433_v14 = vor.u32 %v510_v10, %v430_v11  ;;  %v400_v17 = vld [vmem:[#allocation2 + $0x10] sm:$0xf]  ;;  %v506_v18 = vld [vmem:[#allocation2 + $0x28] sm:$0xf0]  ;;  %v503_v19 = vld [vmem:[#allocation2 + $0x14] sm:$0xf]  ;;  %v409_v21 = vor.u32 %v507_v16, %v408_v15 }
  0x19   :  { %539 = vset.pattern.permute.xlu0 %v600_v1  ;;  %v520_v1 = vld [vmem:[#allocation2 + $0x98] sm:$0xf0]  ;;  %v402_v20 = vld [vmem:[#allocation2 + $0x2c] sm:$0xf0]  ;;  %v401_v22 = vor.u32 %v506_v18, %v400_v17  ;;  %v540_v25 = vld [vmem:[%s658_s1] ss:$0 sm:$0xff] }
  0x1a   :  { %322 = vmatpush.bf16.msrb.mxu0 %v485_v59  ;;  %v457_v4 = vor.u32 %v520_v1, %v456_v63  ;;  %v405_v23 = vor.u32 %v503_v19, %v402_v20  ;;  %v541_v26 = vld [vmem:[%s659_s2] ss:$0 sm:$0xff]  ;;  %v542_v28 = vld [vmem:[%s658_s1 + $0x1] ss:$0 sm:$0xff]  ;;  %v543_v29 = vld [vmem:[%s658_s1 + $0x2] ss:$0 sm:$0xff] }
  0x1b   :  { %348 = vmatpush.bf16.msrb.mxu2 %v493_v55  ;;  %335 = vmatpush.bf16.msrb.mxu1 %v489_v60  ;;  %vm262_vm0 = vcmask 523264   ;;  %v102_v39 = vld [vmem:[%s661_s4] sm:$0x7f]  ;;  %s602_s1 = smov [#allocation5]   ;;  %s372_s11 = sshll.u32 %s662_s5, 4  ;;  %vm363_vm1 = vcmask 130048   ;;  %s373_s11 = int_to_ptr.hbm [resolvable:$true] %s372_s11 }
  0x1c   :  { %v104_v40 = vperm.slane %v102_v39, 0  ;;  %v105_v41 = vperm.slane %v102_v39, 1  ;;  %v106_v46 = vperm.slane %v102_v39, 2  ;;  %v107_v47 = vperm.slane %v102_v39, 3  ;;  %s370_s4 = sshll.u32 %s602_s1, 4  ;;  %s371_s4 = int_to_ptr.vmem [resolvable:$true] %s370_s4 }
  0x1d   :  { %v108_v54 = vperm.slane %v102_v39, 4  ;;  %v109_v55 = vperm.slane %v102_v39, 5  ;;  %v110_v62 = vperm.slane %v102_v39, 6 }
  0x1e   :  { %323 = vmatpush.bf16.msrb.mxu0 %v457_v4 }
  0x1f   :  { %349 = vmatpush.bf16.msrb.mxu2 %v465_v0  ;;  %336 = vmatpush.bf16.msrb.mxu1 %v461_v5 }
  0x22   :  { %324 = vmatpush.bf16.msrb.mxu0 %v429_v13 }
  0x23   :  { %350 = vmatpush.bf16.msrb.mxu2 %v437_v12  ;;  %337 = vmatpush.bf16.msrb.mxu1 %v433_v14 }
  0x26   :  { %325 = vmatpush.bf16.msrb.mxu0 %v401_v22 }
  0x27   :  { %351 = vmatpush.bf16.msrb.mxu2 %v409_v21  ;;  %338 = vmatpush.bf16.msrb.mxu1 %v405_v23 }
  0x7a   :  { %v44_v24 = vpop.permute.xlu0 %43  ;;  %v63_v30 = vpop.permute.xlu1 %62 }
  0x7b   :  { %v47_v27 = vmul.f32 %v540_v25, %v44_v24  ;;  %v66_v34 = vmul.f32 %v543_v29, %v63_v30 }
  0x7d   :  { %v51_v32 = vadd.f32 %v541_v26, %v47_v27 }
  0x83   :  { %v55_v31 = vpop.permute.xlu0 %54 }
  0x84   :  { %v58_v33 = vmul.f32 %v542_v28, %v55_v31 }
  0x86   :  { %v59_v35 = vadd.f32 %v58_v33, %v51_v32 }
  0x88   :  { %v67_v36 = vadd.f32 %v66_v34, %v59_v35 }
  0x8a   :  { %v68_v37 = vmax.f32 %v67_v36, 0.0 }
  0x8c   :  { %v69_v38 = vpack.c.bf16 %v68_v37, %v68_v37 }
  0x8e   :  { %494 = vmatmul.msk.bf16.vlgmr.msra.gmra.mxu0 %vm262_vm0, %v69_v38  ;;  %495 = vmatmul.msk.bf16.vlgmr.msra.gmra.mxu1 %vm262_vm0, %v69_v38 }
  0x8f   :  { %496 = vmatmul.msk.bf16.vlgmr.msra.gmra.mxu2 %vm262_vm0, %v69_v38  ;;  %497 = vmatmul.msk.bf16.vlgmr.msra.gmra.mxu3 %vm262_vm0, %v69_v38 }
  0x9e   :  { %498 = vmatmul.msk.bf16.vlgmr.msrb.gmra.mxu0 %vm262_vm0, %v69_v38  ;;  %499 = vmatmul.msk.bf16.vlgmr.msrb.gmra.mxu1 %vm262_vm0, %v69_v38 }
  0x9f   :  { %500 = vmatmul.msk.bf16.vlgmr.msrb.gmra.mxu2 %vm262_vm0, %v69_v38 }
 0x10b   :  { %v275_v42 = vpop.f32.mrf.mxu0  ;;  %v288_v43 = vpop.f32.mrf.mxu1 }
 0x10c   :  { %v276_v44 = vadd.f32 %v275_v42, %v104_v40  ;;  %v289_v45 = vadd.f32 %v288_v43, %v105_v41 }
 0x10e   :  { %357 = vst [vmem:[#allocation5] sm:$0xff] %v276_v44 }
 0x10f   :  { %358 = vst [vmem:[#allocation5 + $0x8] sm:$0xff] %v289_v45 }
 0x112   :  { %v301_v48 = vpop.f32.mrf.mxu2  ;;  %v314_v49 = vpop.f32.mrf.mxu3 }
 0x113   :  { %v302_v50 = vadd.f32 %v301_v48, %v106_v46  ;;  %v315_v51 = vadd.f32 %v314_v49, %v107_v47  ;;  %v277_v52 = vpop.f32.mrf.mxu0  ;;  %v290_v53 = vpop.f32.mrf.mxu1 }
 0x115   :  { %359 = vst [vmem:[#allocation5 + $0x10] sm:$0xff] %v302_v50 }
 0x116   :  { %360 = vst [vmem:[#allocation5 + $0x18] sm:$0xff] %v315_v51 }
 0x11a   :  { %v303_v56 = vpop.f32.mrf.mxu2  ;;  %v316_v57 = vpop.f32.mrf.mxu3 }
 0x11b   :  { %v327_v58 = vpop.f32.mrf.mxu0  ;;  %v340_v59 = vpop.f32.mrf.mxu1 }
 0x11c   :  { %v328_v60 = vadd.f32 %v327_v58, %v108_v54  ;;  %v341_v61 = vadd.f32 %v340_v59, %v109_v55 }
 0x11e   :  { %361 = vst [vmem:[#allocation5 + $0x20] sm:$0xff] %v328_v60 }
 0x11f   :  { %362 = vst [vmem:[#allocation5 + $0x28] sm:$0xff] %v341_v61 }
 0x122   :  { %v353_v63 = vpop.f32.mrf.mxu2 }
 0x123   :  { %v354_v0 = vadd.f32 %v353_v63, %v110_v62  ;;  %v329_v1 = vpop.f32.mrf.mxu0  ;;  %v342_v2 = vpop.f32.mrf.mxu1 }
 0x125   :  { %364 = vst.msk [vmem:[#allocation5 + $0x30] sm:$0xff] %vm363_vm1, %v354_v0 }
 0x126   :  { %375 = dma.vmem_to_hbm [thread:$0]  %s371_s4, 896, %s373_s11, [#allocation4]  }
 0x12a   :  { %v355_v3 = vpop.f32.mrf.mxu2 }
 0x12b   :  { %594 = dma.done.wait [#allocation4], 896  }
 0x12c   :  { %595 = vsyncadd [#allocation4], 4294966400 }
 0x12d   :  { %380 = vsyncpa [#allocation3], 1 }
 0x12e   :  { %381 = vsyncpa [#allocation4], 1 }

</bundles_post_ra>
